<compile_context>
chip_gen: v7x
topology: tpu7x:2x2x1
jax: 0.10.0
libtpu: 0.0.40
codegen_flags: <defaults>
</compile_context>

<pallas_src>
import jax
import jax.numpy as jnp
from jax.experimental import pallas as pl
from jax.experimental.pallas import tpu as pltpu


def _round_up(a, b):
    return (a + b - 1) // b * b


def _vmem_capacity_bytes():
    # Conservative fallback = v7x per-TC VMEM (64 MiB) if the query is unavailable.
    try:
        info = pltpu.get_tpu_info()
        cap = getattr(info, "vmem_capacity_bytes", None)
        if cap:
            return int(cap)
    except Exception:
        pass
    return 64 * 1024 * 1024


def _select_tiling(B, elem_bytes, budget_bytes):
    """Pick (TR, Bp): row-tile height and lane-aligned padded width."""
    if B <= 128:
        return B, B  # single block, block shape == full array dims (always legal)
    Bp = _round_up(B, 128)
    for cand in (512, 256, 128):
        if Bp % cand != 0:
            continue
        # v7x has 2 TensorCores: keep >= 2 row blocks so the parallel grid axis can
        # actually be sharded once the problem is non-trivial.
        if B >= 256 and Bp // cand < 2:
            continue
        # Double-buffered row block must fit the scoped-VMEM budget.
        if 2 * cand * Bp * elem_bytes <= budget_bytes:
            return cand, Bp
    return 128, Bp


def _make_top1_max_kernel(TR, Bp, B_valid, num_blocks):
    needs_col_mask = Bp > B_valid
    single_block = num_blocks == 1

    def kernel(row_ref, rowsum_ref):
        # row_ref:    (TR, Bp) full (padded) rows of the logit matrix for this block
        # rowsum_ref: (TR, 1)  per-row sum_j (sigmoid(diff)+sigmoid(x^2)) * softmax_j
        x = row_ref[...].astype(jnp.float32)                          # (TR, Bp)

        # Diagonal of this row block, taken from the row tile already in VMEM
        # (no extra HBM DMA). Columns [i*TR, i*TR+TR) hold the block's diagonal.
        if single_block:
            xd = x                                                    # TR == Bp
        else:
            start = pl.program_id(0) * TR
            if TR % 128 == 0:
                start = pl.multiple_of(start, 128)                    # aligned vld
            xd = row_ref[:, pl.ds(start, TR)].astype(jnp.float32)     # (TR, TR)
        r = jax.lax.broadcasted_iota(jnp.int32, xd.shape, 0)
        c = jax.lax.broadcasted_iota(jnp.int32, xd.shape, 1)
        diag = jnp.sum(jnp.where(r == c, xd, 0.0), axis=1, keepdims=True)  # (TR, 1)

        # Mask padded columns out of the softmax / sums (exp(-inf - m) == 0).
        if needs_col_mask:
            col = jax.lax.broadcasted_iota(jnp.int32, x.shape, 1)
            x = jnp.where(col < B_valid, x, -jnp.inf)

        # One shared exp serves both the softmax numerator and sigmoid(x - diag):
        #   sigmoid(x - diag) = e / (e + e_diag),  e = exp(x - m), e_diag = exp(diag - m)
        m = jnp.max(x, axis=1, keepdims=True)                         # (TR, 1)
        e = jnp.exp(x - m)                                            # full-tile EUP #1
        e_diag = jnp.exp(diag - m)                                    # per-row, cheap
        sig_diff = e * pl.reciprocal(e + e_diag + 1e-30, approx=True)
        # sigmoid(x^2) as a single native tanh EUP op (instead of exp + reciprocal).
        sig_sq = 0.5 * jnp.tanh(0.5 * (x * x)) + 0.5                  # full-tile EUP #2

        # Softmax denominator hoisted out of the elementwise path; per-row exact divide
        # (only TR elements, so the extra EUP cost is negligible but removes one layer
        # of approx-reciprocal error).
        weighted = jnp.sum((sig_diff + sig_sq) * e, axis=1, keepdims=True)  # (TR, 1)
        denom = jnp.sum(e, axis=1, keepdims=True)                           # (TR, 1)
        rowsum_ref[...] = weighted / denom

    return kernel


def top1_max_loss(logit, *, block_rows=None, cast_to_bf16=False):
    """logit: (B, B) array. Returns the scalar TOP1-max loss (float32).

    cast_to_bf16: halve HBM traffic on bandwidth-bound parts (v5e); the kernel
    always computes in float32.
    """
    B, B2 = logit.shape
    assert B == B2, "TOP1_MaxLoss expects a square (B, B) logit matrix"

    x = logit
    if cast_to_bf16 and x.dtype != jnp.bfloat16:
        x = x.astype(jnp.bfloat16)
    elem_bytes = jnp.dtype(x.dtype).itemsize

    # Generation-aware VMEM sizing (128 MiB on v5e/v6e, 64 MiB on v7x).
    vmem_cap = _vmem_capacity_bytes()
    vmem_limit = min(vmem_cap * 3 // 4, 96 * 1024 * 1024)
    budget = vmem_limit // 2  # headroom for output buffers / compiler scratch

    if block_rows is None:
        TR, Bp = _select_tiling(B, elem_bytes, budget)
    else:
        TR = block_rows
        assert TR == B or TR % 128 == 0, "block_rows must be a multiple of 128 (or == B)"
        Bp = _round_up(B, TR)
    num_blocks = Bp // TR

    if Bp > B:
        x = jnp.pad(x, ((0, Bp - B), (0, Bp - B)))  # padded cols masked in-kernel

    kernel = _make_top1_max_kernel(TR, Bp, B, num_blocks)

    cost = pl.CostEstimate(
        flops=12 * Bp * Bp,
        transcendentals=3 * Bp * Bp,
        bytes_accessed=Bp * Bp * elem_bytes + Bp * 4,
    )

    row_sums = pl.pallas_call(
        kernel,
        out_shape=jax.ShapeDtypeStruct((Bp, 1), jnp.float32),
        grid=(num_blocks,),
        in_specs=[pl.BlockSpec((TR, Bp), lambda i: (i, 0))],   # full-width row block
        out_specs=pl.BlockSpec((TR, 1), lambda i: (i, 0)),
        compiler_params=pltpu.CompilerParams(
            dimension_semantics=("parallel",),
            vmem_limit_bytes=vmem_limit,
        ),
        cost_estimate=cost,
    )(x)

    # Final mean over the (valid) batch rows in the wrapper; padded rows discarded.
    return jnp.sum(row_sums[:B, 0]) / jnp.float32(B)


def _reference(logit):
    # Pure-JAX reference mirroring the PyTorch forward.
    diag = jnp.diag(logit)[:, None]
    diff = logit - diag
    softmax_scores = jax.nn.softmax(logit, axis=1)
    return jnp.mean(
        jnp.sum((jax.nn.sigmoid(diff) + jax.nn.sigmoid(logit ** 2)) * softmax_scores, axis=1)
    )


if __name__ == "__main__":
    root = jax.random.PRNGKey(0)
    k0, k1, k2 = jax.random.split(root, 3)

    # Small single-block case: B = 8 -> one (8, 8) tile, grid of 1.
    B = 8
    logit = jax.random.normal(k0, (B, B), dtype=jnp.float32)
    loss = jax.block_until_ready(top1_max_loss(logit))
    ref = _reference(logit)
    assert jnp.allclose(loss, ref, atol=3e-3, rtol=3e-3), (loss, ref)

    # Non-128-multiple case: exercises the padding + column-mask path (B=200 -> Bp=256).
    B1 = 200
    logit1 = jax.random.normal(k1, (B1, B1), dtype=jnp.float32)
    loss1 = jax.block_until_ready(top1_max_loss(logit1))
    ref1 = _reference(logit1)
    assert jnp.allclose(loss1, ref1, atol=3e-3, rtol=3e-3), (loss1, ref1)

    # Multi-block case: tiled / pipelined / parallel-grid path with in-VMEM diag slice.
    B2 = 256
    logit2 = jax.random.normal(k2, (B2, B2), dtype=jnp.float32)
    loss2 = jax.block_until_ready(top1_max_loss(logit2, block_rows=128))
    ref2 = _reference(logit2)
    assert jnp.allclose(loss2, ref2, atol=3e-3, rtol=3e-3), (loss2, ref2)

    print("KERNEL_OK")
</pallas_src>

<mosaic_0001>
module attributes {stable_mosaic.version = 11 : i64} {
  func.func @kernel(%arg0: i32, %arg1: memref<8x8xf32, #tpu.memory_space<vmem>>, %arg2: memref<8x1xf32, #tpu.memory_space<vmem>>) attributes {dimension_semantics = [#tpu.dimension_semantics<parallel>], iteration_bounds = array<i64: 1>, scalar_prefetch = 0 : i64, scratch_operands = 0 : i64, tpu.core_type = #tpu.core_type<tc>, window_params = [{transform_indices = @transform_0, window_bounds = array<i64: 8, 8>}, {transform_indices = @transform_1, window_bounds = array<i64: 8, 1>}]} {
    %c0 = arith.constant 0 : index
    %c0_0 = arith.constant 0 : index
    %0 = vector.load %arg1[%c0, %c0_0] : memref<8x8xf32, #tpu.memory_space<vmem>>, vector<8x8xf32>
    %1 = tpu.iota {dimensions = array<i32: 0>} : vector<8x8xi32>
    %2 = tpu.iota {dimensions = array<i32: 1>} : vector<8x8xi32>
    %3 = arith.cmpi eq, %1, %2 : vector<8x8xi32>
    %cst = arith.constant 0.000000e+00 : f32
    %4 = vector.broadcast %cst : f32 to vector<8x8xf32>
    %5 = arith.select %3, %0, %4 : vector<8x8xi1>, vector<8x8xf32>
    %cst_1 = arith.constant dense<0.000000e+00> : vector<8xf32>
    %6 = vector.multi_reduction <add>, %5, %cst_1 [1] : vector<8x8xf32> to vector<8xf32>
    %7 = vector.shape_cast %6 : vector<8xf32> to vector<8x1xf32>
    %cst_2 = arith.constant dense<0xFF800000> : vector<8xf32>
    %8 = vector.multi_reduction <maximumf>, %0, %cst_2 [1] : vector<8x8xf32> to vector<8xf32>
    %9 = vector.shape_cast %8 : vector<8xf32> to vector<8x1xf32>
    %10 = vector.broadcast %9 : vector<8x1xf32> to vector<8x8xf32>
    %11 = arith.subf %0, %10 : vector<8x8xf32>
    %12 = math.exp %11 : vector<8x8xf32>
    %13 = arith.subf %7, %9 : vector<8x1xf32>
    %14 = math.exp %13 : vector<8x1xf32>
    %15 = vector.broadcast %14 : vector<8x1xf32> to vector<8x8xf32>
    %16 = arith.addf %12, %15 : vector<8x8xf32>
    %cst_3 = arith.constant 1.000000e-30 : f32
    %17 = vector.broadcast %cst_3 : f32 to vector<8x8xf32>
    %18 = arith.addf %16, %17 : vector<8x8xf32>
    %19 = tpu.reciprocal %18 {approx = true} : vector<8x8xf32> -> vector<8x8xf32>
    %20 = arith.mulf %12, %19 : vector<8x8xf32>
    %21 = arith.mulf %0, %0 : vector<8x8xf32>
    %cst_4 = arith.constant 5.000000e-01 : f32
    %22 = vector.broadcast %cst_4 : f32 to vector<8x8xf32>
    %23 = arith.mulf %22, %21 : vector<8x8xf32>
    %24 = math.tanh %23 : vector<8x8xf32>
    %cst_5 = arith.constant 5.000000e-01 : f32
    %25 = vector.broadcast %cst_5 : f32 to vector<8x8xf32>
    %26 = arith.mulf %25, %24 : vector<8x8xf32>
    %cst_6 = arith.constant 5.000000e-01 : f32
    %27 = vector.broadcast %cst_6 : f32 to vector<8x8xf32>
    %28 = arith.addf %26, %27 : vector<8x8xf32>
    %29 = arith.addf %20, %28 : vector<8x8xf32>
    %30 = arith.mulf %29, %12 : vector<8x8xf32>
    %cst_7 = arith.constant dense<0.000000e+00> : vector<8xf32>
    %31 = vector.multi_reduction <add>, %30, %cst_7 [1] : vector<8x8xf32> to vector<8xf32>
    %32 = vector.shape_cast %31 : vector<8xf32> to vector<8x1xf32>
    %cst_8 = arith.constant dense<0.000000e+00> : vector<8xf32>
    %33 = vector.multi_reduction <add>, %12, %cst_8 [1] : vector<8x8xf32> to vector<8xf32>
    %34 = vector.shape_cast %33 : vector<8xf32> to vector<8x1xf32>
    %35 = arith.divf %32, %34 : vector<8x1xf32>
    %c0_9 = arith.constant 0 : index
    %c0_10 = arith.constant 0 : index
    %36 = vector.load %arg2[%c0_9, %c0_10] : memref<8x1xf32, #tpu.memory_space<vmem>>, vector<8x1xf32>
    tpu.vector_store %arg2[%c0_9, %c0_10], %35 {strides = array<i32>} : memref<8x1xf32, #tpu.memory_space<vmem>>, vector<8x1xf32>,
    return
  }
  func.func @transform_0(%arg0: i32) -> (i32, i32) {
    %c0_i32 = arith.constant 0 : i32
    %c0_i32_0 = arith.constant 0 : i32
    return %arg0, %c0_i32 : i32, i32
  }
  func.func @transform_1(%arg0: i32) -> (i32, i32) {
    %c0_i32 = arith.constant 0 : i32
    %c0_i32_0 = arith.constant 0 : i32
    return %arg0, %c0_i32 : i32, i32
  }
}

</mosaic_0001>

<bundles_post_ra>
// kernel: tpu_custom_call.1
= control target key start
LH: loop header
LB: loop body
LE: loop exit
PB: predicated region body
PF: predicated region fallthrough
CT: control target
= control target key end

     0   :  { %6 = vsyncpa [#allocation3], 0  ;;  %s101_s6 = smov [#allocation2]   ;;  %s131_s0 = inlined_call_operand.hbm [shape: f32[8,8], index: 0, kind: input, shape index: {}]   ;;  %s132_s1 = inlined_call_operand.vmem [shape: f32[8,1], index: 1, kind: output, shape index: {}]  }
   0x1   :  { %s13_s7 = sshll.u32 %s101_s6, 4  ;;  %s77_s10 = scalar_lea.hbm %s131_s0, 128  ;;  %s14_s7 = int_to_ptr.vmem [resolvable:$true] %s13_s7 }
   0x2   :  { %p78_p0 = scmp.ne.s32.totalorder %s131_s0, %s77_s10  ;;  %p81_p1 = scmp.lt.u32.totalorder %s77_s10, %s131_s0 }
   0x4   :  { %p83_p2 = pnand %p81_p1, %p78_p0 }
   0x6   :  { %86 = shalt.err (!%p83_p2)
}
   0x7   :  { %s87_s15 = scalar_lea.vmem %s14_s7, 128  ;;  %p92_p4 = scmp.lt.s32.totalorder %s14_s7, %s14_s7 }
   0x8   :  { %p88_p3 = scmp.ne.s32.totalorder %s14_s7, %s87_s15  ;;  %p93_p5 = scmp.lt.s32.totalorder %s87_s15, %s87_s15 }
   0xa   :  { %p94_p6 = por %p93_p5, %p92_p4 }
   0xc   :  { %p95_p7 = pnand %p94_p6, %p88_p3 }
   0xe   :  { %98 = shalt.err (!%p95_p7)
}
   0xf   :  { %16 = dma.hbm_to_vmem [thread:$0]  %s131_s0, 128, %s14_s7, [#allocation3]  }
  0x10   :  { %99 = dma.done.wait [#allocation3], 128  }
  0x11   :  { %100 = vsyncadd [#allocation3], 4294967168  ;;  %v21_v0 = vlaneseq  ;;  %vm27_vm1 = vcmask 64512   ;;  %v20_v3 = vld [vmem:[#allocation2] sm:$0xff]  ;;  %vm59_vm2 = vcmask 7168  }
  0x12   :  { %v31_v6 = vsel %vm27_vm1, %v20_v3, -inf  ;;  %v44_v13 = vmul.f32 %v20_v3, %v20_v3 }
  0x13   :  { %v22_v1 = vshrl.u32 %v21_v0, 7  ;;  %v24_v2 = vand.u32 127, %v21_v0 }
  0x14   :  { %v45_v14 = vmul.f32 0.5, %v44_v13 }
  0x15   :  { %vm25_vm0 = vcmp.eq.s32.totalorder %v22_v1, %v24_v2 }
  0x16   :  { %v26_v4 = vsel %vm25_vm0, %v20_v3, 0.0 }
  0x17   :  { %v28_v5 = vsel %vm27_vm1, %v26_v4, 0.0 }
  0x18   :  { %29 = vadd.xlane.f32.xlu0 %v28_v5 }
  0x1c   :  { %32 = vmax.xlane.f32.xlu0 %v31_v6 }
  0xa5   :  { %v30_v7 = vpop.xlane.xlu0 %29 }
  0xa9   :  { %v33_v8 = vpop.xlane.xlu0 %32 }
  0xaa   :  { %v34_v9 = vsub.f32 %v20_v3, %v33_v8  ;;  %v37_v10 = vsub.f32 %v30_v7, %v33_v8 }
  0xac   :  { %v35_v11 = vmul.f32 1.442695, %v34_v9  ;;  %v38_v12 = vmul.f32 1.442695, %v37_v10 }
  0xae   :  { %67 = vpow2.f32 %v35_v11 }
  0xaf   :  { %69 = vpow2.f32 %v38_v12 }
  0xb0   :  { %71 = vtanh.f32 %v45_v14 }
  0xb8   :  { %v68_v15 = vpop.eup %67 }
  0xb9   :  { %v70_v16 = vpop.eup %69  ;;  %v54_v17 = vsel %vm27_vm1, %v68_v15, 0.0 }
  0xba   :  { %v40_v18 = vadd.f32 %v70_v16, %v68_v15  ;;  %55 = vadd.xlane.f32.xlu1 %v54_v17  ;;  %v72_v20 = vpop.eup %71 }
  0xbb   :  { %v47_v21 = vmul.f32 0.5, %v72_v20 }
  0xbc   :  { %v41_v19 = vadd.f32 1e-30, %v40_v18 }
  0xbd   :  { %v48_v22 = vadd.f32 0.5, %v47_v21 }
  0xbe   :  { %73 = vrcp.f32 %v41_v19 }
  0xc8   :  { %v74_v23 = vpop.eup %73 }
  0xc9   :  { %v43_v24 = vmul.f32 %v74_v23, %v68_v15 }
  0xcb   :  { %v49_v25 = vadd.f32 %v48_v22, %v43_v24 }
  0xcd   :  { %v50_v26 = vmul.f32 %v68_v15, %v49_v25 }
  0xcf   :  { %v51_v27 = vsel %vm27_vm1, %v50_v26, 0.0 }
  0xd0   :  { %52 = vadd.xlane.f32.xlu1 %v51_v27 }
 0x147   :  { %v56_v28 = vpop.xlane.xlu1 %55 }
 0x148   :  { %75 = vrcp.f32 %v56_v28 }
 0x152   :  { %v76_v29 = vpop.eup %75 }
 0x15d   :  { %v53_v30 = vpop.xlane.xlu1 %52 }
 0x15e   :  { %v58_v31 = vmul.f32 %v76_v29, %v53_v30 }
 0x160   :  { %60 = vst.msk [vmem:[%s132_s1] sm:$0xff] %vm59_vm2, %v58_v31 }
 0x161   :  { %65 = vsyncpa [#allocation3], 1 }

</bundles_post_ra>
